<compile_context>
chip_gen: v5e
topology: v5e:2x2
jax: 0.10.0
libtpu: 0.0.40
codegen_flags: <defaults>
</compile_context>

<pallas_src>
import functools

import jax
import jax.numpy as jnp
from jax.experimental import pallas as pl
from jax.experimental.pallas import tpu as pltpu

CLS_CHANNELS = 16
LOG_CLAMP = -100.0            # PyTorch F.binary_cross_entropy clamps log terms at -100
DEFAULT_MAX_TILE = 16384      # lanes per grid step (multiple of 128)
VMEM_LIMIT_BYTES = 48 * 1024 * 1024   # fits v7x (64 MiB physical) with headroom


def _round_up(x, m):
    return (x + m - 1) // m * m


def _choose_tile(n, batch, max_tile=DEFAULT_MAX_TILE):
    """Largest lane tile (multiple of 128) that fits the budget; keep >=2 grid
    steps when possible so v7x's two TensorCores both get work."""
    tile = min(max_tile, _round_up(max(n, 1), 128))
    if batch * pl.cdiv(n, tile) < 2 and n > 128:
        tile = _round_up(pl.cdiv(n, 2), 128)
    return tile


# ----------------------------------------------------------------------------
# In-kernel math helpers (pl.reciprocal => kernel-only)
# ----------------------------------------------------------------------------
def _logsig_parts(x):
    """Return (log_sigmoid(x) UNclamped, z=exp(-|x|)) — one exp + one log1p."""
    z = jnp.exp(-jnp.abs(x))
    ls = jnp.minimum(x, 0.0) - jnp.log1p(z)
    return ls, z


def _sigmoid_from_parts(x, z):
    """sigmoid(x) from z=exp(-|x|) via an (approx) EUP reciprocal — no extra exp."""
    r = pl.reciprocal(1.0 + z, approx=True)
    return jnp.where(x >= 0.0, r, z * r)


def _sigmoid_fast(x):
    z = jnp.exp(-jnp.abs(x))
    return _sigmoid_from_parts(x, z)


# ----------------------------------------------------------------------------
# Kernels
# ----------------------------------------------------------------------------
def _prep_kernel(t_cls_ref, maxv_ref, psum_ref, *, n_valid, tile_n):
    """sigmoid(teacher cls): per-position (per-lane) max and per-tile prob sum."""
    ti = pl.program_id(1)
    col = ti * tile_n + jax.lax.broadcasted_iota(jnp.int32, (1, 1, tile_n), 2)
    valid = col < n_valid                                        # (1, 1, T)

    t = jax.nn.sigmoid(t_cls_ref[...].astype(jnp.float32))      # (1, C, T)
    m = jnp.max(t, axis=1, keepdims=True)                        # sublane reduce -> (1,1,T)
    # Tail lanes of a partial last tile hold garbage: mask so they never win top-k.
    maxv_ref[...] = jnp.where(valid, m, -1.0)

    s = jnp.sum(jnp.where(valid, t, 0.0))
    psum_ref[...] = jnp.broadcast_to(s, (1, 1, 8, 128))


def _loss_kernel(s_cls_ref, t_cls_ref, s_bbox_ref, t_bbox_ref,
                 s_ctr_ref, t_ctr_ref, mask_ref,
                 qfl_ref, bbox_ref, ctr_ref, *, n_valid, tile_n):
    ti = pl.program_id(1)
    col = ti * tile_n + jax.lax.broadcasted_iota(jnp.int32, (1, 1, tile_n), 2)
    valid = col < n_valid                                        # (1, 1, T) bool
    is_pos = mask_ref[...] > 0.0                                 # (1, 1, T) bool
    pos_valid = jnp.logical_and(valid, is_pos)

    # ---- QFLv2 classification loss (beta=2, reduction='sum') ----
    x = s_cls_ref[...].astype(jnp.float32)                       # (1, C, T) student logits
    ls, z = _logsig_parts(x)                                     # log(sigmoid(x)) unclamped
    log_p = jnp.maximum(ls, LOG_CLAMP)                           # log(sigmoid(x)), clamped
    log_1mp = jnp.maximum(ls - x, LOG_CLAMP)                     # log(1-sigmoid(x)), clamp LAST
    p = _sigmoid_from_parts(x, z)                                # sigmoid(x) (no extra exp)
    t = _sigmoid_fast(t_cls_ref[...].astype(jnp.float32))        # teacher probs

    neg_loss = (-log_1mp) * p * p                                # BCE(p, 0) * p^2
    bce_pt = -(t * log_p + (1.0 - t) * log_1mp)                  # BCE(p, t)
    diff = t - p
    pos_loss = bce_pt * diff * diff                              # * (t - p)^2
    qfl = jnp.where(valid, jnp.where(is_pos, pos_loss, neg_loss), 0.0)
    qfl_ref[...] = jnp.broadcast_to(jnp.sum(qfl), (1, 1, 8, 128))

    # ---- bbox SmoothL1 * sigmoid(teacher centerness), positives only (sum) ----
    d = s_bbox_ref[...].astype(jnp.float32) - t_bbox_ref[...].astype(jnp.float32)
    ad = jnp.abs(d)
    sl1 = jnp.where(ad < 1.0, 0.5 * d * d, ad - 0.5)             # SmoothL1, beta=1
    t_ctr_sig = _sigmoid_fast(t_ctr_ref[...].astype(jnp.float32))    # (1, 1, T)
    bbox_elem = jnp.where(pos_valid, sl1 * t_ctr_sig, 0.0)       # broadcasts over 5 channels
    bbox_ref[...] = jnp.broadcast_to(jnp.sum(bbox_elem), (1, 1, 8, 128))

    # ---- centerness BCE(sigmoid(s), sigmoid(t)), positives only (sum) ----
    xs = s_ctr_ref[...].astype(jnp.float32)                      # (1, 1, T)
    ls_c, _ = _logsig_parts(xs)
    log_sp = jnp.maximum(ls_c, LOG_CLAMP)
    log_1msp = jnp.maximum(ls_c - xs, LOG_CLAMP)
    bce_c = -(t_ctr_sig * log_sp + (1.0 - t_ctr_sig) * log_1msp)
    ctr_ref[...] = jnp.broadcast_to(jnp.sum(jnp.where(pos_valid, bce_c, 0.0)),
                                    (1, 1, 8, 128))


# ----------------------------------------------------------------------------
# pallas_call wrappers
# ----------------------------------------------------------------------------
def _compiler_params():
    return pltpu.CompilerParams(dimension_semantics=("parallel", "parallel"),
                                vmem_limit_bytes=VMEM_LIMIT_BYTES)


def _prep_call(t_cls, n, tile):
    b, c, _ = t_cls.shape
    num_tiles = pl.cdiv(n, tile)
    kernel = functools.partial(_prep_kernel, n_valid=n, tile_n=tile)
    return pl.pallas_call(
        kernel,
        grid=(b, num_tiles),
        in_specs=[pl.BlockSpec((1, c, tile), lambda bi, ti: (bi, 0, ti))],
        out_specs=[pl.BlockSpec((1, 1, tile), lambda bi, ti: (bi, 0, ti)),
                   pl.BlockSpec((1, 1, 8, 128), lambda bi, ti: (bi, ti, 0, 0))],
        out_shape=[jax.ShapeDtypeStruct((b, 1, n), jnp.float32),
                   jax.ShapeDtypeStruct((b, num_tiles, 8, 128), jnp.float32)],
        compiler_params=_compiler_params(),
    )(t_cls)


def _loss_call(s_cls, t_cls, s_bbox, t_bbox, s_ctr, t_ctr, mask, n, tile):
    b, c, _ = s_cls.shape
    num_tiles = pl.cdiv(n, tile)
    kernel = functools.partial(_loss_kernel, n_valid=n, tile_n=tile)

    def spec(ch):
        return pl.BlockSpec((1, ch, tile), lambda bi, ti: (bi, 0, ti))

    part_spec = pl.BlockSpec((1, 1, 8, 128), lambda bi, ti: (bi, ti, 0, 0))
    part_shape = jax.ShapeDtypeStruct((b, num_tiles, 8, 128), jnp.float32)
    return pl.pallas_call(
        kernel,
        grid=(b, num_tiles),
        in_specs=[spec(c), spec(c), spec(5), spec(5), spec(1), spec(1), spec(1)],
        out_specs=[part_spec, part_spec, part_spec],
        out_shape=[part_shape, part_shape, part_shape],
        compiler_params=_compiler_params(),
    )(s_cls, t_cls, s_bbox, t_bbox, s_ctr, t_ctr, mask)


# ----------------------------------------------------------------------------
# Module glue (matches RotatedDTBLLoss.convert_shape / forward, 'l1' branch)
# ----------------------------------------------------------------------------
def convert_shape(logits, cls_channels=CLS_CHANNELS):
    """(B, C, N) channel-on-sublanes / position-on-lanes layout, built with
    reshape + concat only (no transpose -> no full HBM relayout).  A position
    index within a batch matches the PyTorch flattening (level-major, then
    h-major spatial), so top-k indices map 1:1 to the reference rows."""
    cls_scores, bbox_preds, angle_preds, centernesses = logits
    assert len(cls_scores) == len(bbox_preds) == len(angle_preds) == len(centernesses)

    def flat(x):  # (B, C, H, W) -> (B, C, H*W)
        b, c, h, w = x.shape
        return x.reshape(b, c, h * w)

    cls = jnp.concatenate([flat(x) for x in cls_scores], axis=2)
    assert cls.shape[1] == cls_channels
    bbox = jnp.concatenate(
        [flat(jnp.concatenate([x, y], axis=1)) for x, y in zip(bbox_preds, angle_preds)],
        axis=2)
    ctr = jnp.concatenate([flat(x) for x in centernesses], axis=2)
    return cls, bbox, ctr


def rotated_dtbl_loss(teacher_logits, student_logits, ratio=0.01,
                      cls_channels=CLS_CHANNELS, max_tile=DEFAULT_MAX_TILE):
    t_cls, t_bbox, t_ctr = convert_shape(teacher_logits, cls_channels)
    s_cls, s_bbox, s_ctr = convert_shape(student_logits, cls_channels)
    b, c, n = t_cls.shape
    tile = _choose_tile(n, b, max_tile)

    # ---- pseudo-label selection: top-k over per-position max teacher prob ----
    maxv, psum_part = _prep_call(t_cls, n, tile)
    topk = max(int(b * n * ratio), 1)   # guard against div-by-zero for tiny N
    # TODO(synk): jax.lax.top_k tie-breaking may differ from torch.topk; for very
    # large B*N consider jax.lax.approx_max_k here.
    top_vals, top_inds = jax.lax.top_k(maxv.reshape(-1), topk)
    mask = jnp.zeros((b * n,), jnp.float32).at[top_inds].set(1.0).reshape(b, 1, n)
    fg_num = jnp.sum(top_vals)
    S_dps = jnp.sum(psum_part[:, :, 0, 0]) / (b * n * c)

    qfl_part, bbox_part, ctr_part = _loss_call(
        s_cls, t_cls, s_bbox, t_bbox, s_ctr, t_ctr, mask, n, tile)

    loss_cls = jnp.sum(qfl_part[:, :, 0, 0]) / fg_num
    loss_bbox = jnp.sum(bbox_part[:, :, 0, 0]) / (topk * 5)      # mean over (num_pos, 5)
    loss_centerness = jnp.sum(ctr_part[:, :, 0, 0]) / topk       # mean over (num_pos, 1)
    return dict(loss_cls=loss_cls, loss_bbox=loss_bbox,
                loss_centerness=loss_centerness, S_dps=S_dps)


# ----------------------------------------------------------------------------
# Example run
# ----------------------------------------------------------------------------
def _make_logits(key, batch, spatials, cls_channels):
    cls_l, bbox_l, ang_l, ctr_l = [], [], [], []
    for (h, w) in spatials:
        key, k1, k2, k3, k4 = jax.random.split(key, 5)
        cls_l.append(jax.random.normal(k1, (batch, cls_channels, h, w), jnp.float32))
        bbox_l.append(jax.random.normal(k2, (batch, 4, h, w), jnp.float32))
        ang_l.append(jax.random.normal(k3, (batch, 1, h, w), jnp.float32))
        ctr_l.append(jax.random.normal(k4, (batch, 1, h, w), jnp.float32))
    return (cls_l, bbox_l, ang_l, ctr_l), key


if __name__ == "__main__":
    key = jax.random.PRNGKey(0)
    batch = 2
    # 5 FPN levels (strides 8..128 in the original module), small spatial sizes.
    spatials = [(8, 8), (4, 4), (2, 2), (2, 2), (2, 2)]

    teacher_logits, key = _make_logits(key, batch, spatials, CLS_CHANNELS)
    student_logits, key = _make_logits(key, batch, spatials, CLS_CHANNELS)

    losses = rotated_dtbl_loss(teacher_logits, student_logits, ratio=0.1)
    losses = jax.tree_util.tree_map(jax.block_until_ready, losses)

    for k in ("loss_cls", "loss_bbox", "loss_centerness", "S_dps"):
        assert bool(jnp.isfinite(losses[k])), f"{k} is not finite"
    print("KERNEL_OK")
</pallas_src>

<mosaic_0001>
module attributes {stable_mosaic.version = 11 : i64} {
  func.func @_prep_kernel(%arg0: i32, %arg1: i32, %arg2: memref<1x16x128xf32, #tpu.memory_space<vmem>>, %arg3: memref<1x1x128xf32, #tpu.memory_space<vmem>>, %arg4: memref<1x1x8x128xf32, #tpu.memory_space<vmem>>) attributes {dimension_semantics = [#tpu.dimension_semantics<parallel>, #tpu.dimension_semantics<parallel>], iteration_bounds = array<i64: 2, 1>, scalar_prefetch = 0 : i64, scratch_operands = 0 : i64, tpu.core_type = #tpu.core_type<tc>, window_params = [{transform_indices = @transform_0, window_bounds = array<i64: 1, 16, 128>}, {transform_indices = @transform_1, window_bounds = array<i64: 1, 1, 128>}, {transform_indices = @transform_2, window_bounds = array<i64: 1, 1, 8, 128>}]} {
    %c128_i32 = arith.constant 128 : i32
    %0 = arith.muli %arg1, %c128_i32 : i32
    %1 = tpu.iota {dimensions = array<i32: 2>} : vector<1x1x128xi32>
    %2 = vector.broadcast %0 : i32 to vector<1x1x128xi32>
    %3 = arith.addi %2, %1 : vector<1x1x128xi32>
    %c92_i32 = arith.constant 92 : i32
    %4 = vector.broadcast %c92_i32 : i32 to vector<1x1x128xi32>
    %5 = arith.cmpi slt, %3, %4 : vector<1x1x128xi32>
    %c0 = arith.constant 0 : index
    %c0_0 = arith.constant 0 : index
    %c0_1 = arith.constant 0 : index
    %6 = vector.load %arg2[%c0, %c0_0, %c0_1] : memref<1x16x128xf32, #tpu.memory_space<vmem>>, vector<1x16x128xf32>
    %7 = arith.negf %6 : vector<1x16x128xf32>
    %8 = math.exp %7 : vector<1x16x128xf32>
    %cst = arith.constant 1.000000e+00 : f32
    %9 = vector.broadcast %cst : f32 to vector<1x16x128xf32>
    %10 = arith.addf %9, %8 : vector<1x16x128xf32>
    %11 = arith.divf %9, %10 : vector<1x16x128xf32>
    %cst_2 = arith.constant dense<0xFF800000> : vector<1x128xf32>
    %12 = vector.multi_reduction <maximumf>, %11, %cst_2 [1] : vector<1x16x128xf32> to vector<1x128xf32>
    %13 = vector.shape_cast %12 : vector<1x128xf32> to vector<1x1x128xf32>
    %cst_3 = arith.constant -1.000000e+00 : f32
    %14 = vector.broadcast %cst_3 : f32 to vector<1x1x128xf32>
    %15 = arith.select %5, %13, %14 : vector<1x1x128xi1>, vector<1x1x128xf32>
    %c0_4 = arith.constant 0 : index
    %c0_5 = arith.constant 0 : index
    %c0_6 = arith.constant 0 : index
    %16 = vector.load %arg3[%c0_4, %c0_5, %c0_6] : memref<1x1x128xf32, #tpu.memory_space<vmem>>, vector<1x1x128xf32>
    tpu.vector_store %arg3[%c0_4, %c0_5, %c0_6], %15 {strides = array<i32>} : memref<1x1x128xf32, #tpu.memory_space<vmem>>, vector<1x1x128xf32>,
    %cst_7 = arith.constant 0.000000e+00 : f32
    %17 = vector.shape_cast %5 : vector<1x1x128xi1> to vector<1x1x128xi1>
    %18 = vector.broadcast %17 : vector<1x1x128xi1> to vector<1x16x128xi1>
    %19 = vector.broadcast %cst_7 : f32 to vector<1x16x128xf32>
    %20 = arith.select %18, %11, %19 : vector<1x16x128xi1>, vector<1x16x128xf32>
    %21 = vector.shape_cast %20 : vector<1x16x128xf32> to vector<1x1x16x128xf32>
    %cst_8 = arith.constant dense<0.000000e+00> : vector<1xf32>
    %22 = vector.multi_reduction <add>, %21, %cst_8 [1, 2, 3] : vector<1x1x16x128xf32> to vector<1xf32>
    %23 = vector.shape_cast %22 : vector<1xf32> to vector<1x1x1x1xf32>
    %24 = vector.extract %23[0, 0, 0, 0] : f32 from vector<1x1x1x1xf32>
    %25 = vector.broadcast %24 : f32 to vector<1x1x8x128xf32>
    %c0_9 = arith.constant 0 : index
    %c0_10 = arith.constant 0 : index
    %c0_11 = arith.constant 0 : index
    %c0_12 = arith.constant 0 : index
    %26 = vector.load %arg4[%c0_9, %c0_10, %c0_11, %c0_12] : memref<1x1x8x128xf32, #tpu.memory_space<vmem>>, vector<1x1x8x128xf32>
    tpu.vector_store %arg4[%c0_9, %c0_10, %c0_11, %c0_12], %25 {strides = array<i32>} : memref<1x1x8x128xf32, #tpu.memory_space<vmem>>, vector<1x1x8x128xf32>,
    return
  }
  func.func @transform_0(%arg0: i32, %arg1: i32) -> (i32, i32, i32) {
    %c0_i32 = arith.constant 0 : i32
    %c0_i32_0 = arith.constant 0 : i32
    return %arg0, %c0_i32, %arg1 : i32, i32, i32
  }
  func.func @transform_1(%arg0: i32, %arg1: i32) -> (i32, i32, i32) {
    %c0_i32 = arith.constant 0 : i32
    %c0_i32_0 = arith.constant 0 : i32
    return %arg0, %c0_i32, %arg1 : i32, i32, i32
  }
  func.func @transform_2(%arg0: i32, %arg1: i32) -> (i32, i32, i32, i32) {
    %c0_i32 = arith.constant 0 : i32
    %c0_i32_0 = arith.constant 0 : i32
    %c0_i32_1 = arith.constant 0 : i32
    return %arg0, %arg1, %c0_i32, %c0_i32_0 : i32, i32, i32, i32
  }
}

</mosaic_0001>

<bundles_post_ra>
// kernel: tpu_custom_call.1
= control target key start
LH: loop header
LB: loop body
LE: loop exit
PB: predicated region body
PF: predicated region fallthrough
CT: control target
= control target key end

     0   :  { %8 = vsyncpa [#allocation3], 0  ;;  %s808_s0 = inlined_call_operand.hbm [shape: f32[2,16,92], index: 0, kind: input, shape index: {}]   ;;  %s809_s1 = inlined_call_operand.hbm [shape: f32[2,1,92], index: 1, kind: output, shape index: {0}]   ;;  %s810_s2 = inlined_call_operand.hbm [shape: f32[2,1,8,128], index: 2, kind: output, shape index: {1}]  }
   0x1   :  { %10 = vsyncpa [#allocation3 + $0x1], 0 }
   0x2   :  { %11 = vsyncpa [#allocation4], 0 }
   0x3   :  { %13 = vsyncpa [#allocation4 + $0x1], 0 }
   0x4   :  { %14 = vsyncpa [#allocation7], 0 }
   0x5   :  { %16 = vsyncpa [#allocation7 + $0x1], 0  ;;  %s668_s9 = smov 0   ;;  %s670_s10 = smov 0  }
   0x6   :  { %s672_s11 = smov 0   ;;  %s674_s12 = smov 0  }
   0x7   :  { %s676_s13 = smov 0   ;;  %s678_s14 = smov 0  }
   0x8 LB: > { %s409_s15 = sadd.s32 4294967295, %s649_s14   ;;  %s410_s16 = sadd.s32 4294967294, %s649_s14   ;;  %s649_s14 = sphi %s678_s14, %s22_s14   ;;  %s645_s13 = sphi %s676_s13, %s819_s13   ;;  %s641_s12 = sphi %s674_s12, %s818_s12   ;;  %s637_s11 = sphi %s672_s11, %s817_s11   ;;  %s633_s10 = sphi %s670_s10, %s816_s10   ;;  %s629_s9 = sphi %s668_s9, %s815_s9  }
   0x9   : > { %s34_s17 = sadd.s32 1, %s645_s13  ;;  %s43_s18 = sadd.s32 1, %s637_s11 }
   0xa   : > { %p36_p0 = scmp.ge.s32.totalorder %s34_s17, 2  ;;  %p50_p1 = scmp.ne.s32.totalorder %s637_s11, %s633_s10 }
   0xb   : > { %p51_p2 = scmp.eq.s32.totalorder %s649_s14, 0  ;;  %p56_p3 = scmp.ne.s32.totalorder %s633_s10, %s629_s9 }
   0xc   : > { %s821_s17 = smov (%p36_p0, %s34_s17), 0  ;;  %p57_p5 = scmp.eq.s32.totalorder %s409_s15, 0 }
   0xd   : > { %p709_p4 = por %p51_p2, %p50_p1  ;;  %s38_s20 = ssub.s32 %s645_s13, %s821_s17 }
   0xe   : > { %p82_p6 = scmp.eq.s32.totalorder %s409_s15, 1  ;;  %p41_p7 = scmp.eq.s32.totalorder %s38_s20, 0 }
   0xf   : > { %p715_p8 = por %p57_p5, %p56_p3  ;;  %p88_p10 = scmp.eq.s32.totalorder %s410_s16, 1 }
  0x10   : > { %p719_p9 = por %p82_p6, %p50_p1  ;;  %p412_p12 = scmp.ge.s32.totalorder %s649_s14, 2 }
  0x11   : > { %s724_s23 = scalar_select %p41_p7, %s637_s11, %s43_s18  }
  0x12   : > { %p726_p11 = por %p88_p10, %p56_p3  ;;  %p445_p13 = scmp.lt.s32.totalorder %s649_s14, 2 }
  0x13   : > { %s136_s25 = sand.u32 1, %s637_s11   ;;  %s425_s27 = sshll.u32 %s645_s13, 4 }
  0x14   : > { %s413_s26 = sshll.u32 %s136_s25, 4  ;;  %s146_s30 = scalar_lea.hbm %s808_s0, %s425_s27 }
  0x15   : > { %s140_s3 = scalar_lea.vmem [#allocation2], %s413_s26  ;;  %s147_s5 = sshll.u32 %s146_s30, 4  ;;  %s148_s5 = int_to_ptr.hbm [resolvable:$true] %s147_s5 }
  0x16   : > { %s149_s4 = sshll.u32 %s140_s3, 4  ;;  %p435_p0 = pnand %p445_p13, %p709_p4  ;;  %s150_s4 = int_to_ptr.vmem [resolvable:$true] %s149_s4 }
  0x17   : > { %p416_p1 = scmp.ge.s32.totalorder %s649_s14, 1  ;;  %s137_s6 = scalar_lea.sflag [#allocation3], %s136_s25 }
  0x18   : > { %s651_s7 = smov 128   ;;  %s652_s8 = smov 8  }
  0x19   : > { %437 = dma.hbm_to_vmem [thread:$0]  (!%p435_p0), %s148_s5, 256, %s150_s4, %s137_s6, %s651_s7, %s651_s7, %s652_s8  }
  0x1a   : > { %p157_p2 = scmp.lt.s32.totalorder %s649_s14, 3 }
  0x1c   : > { %p158_p3 = pnand %p416_p1, %p157_p2 }
  0x1d   : > { %s742_s15 = sand.u32 (!%p158_p3), 1, %s633_s10  }
  0x1e   : > { %161 = sbr.rel (%p158_p3) target bundleno = 251 (0xfb), region = 24  ;;  %s417_s16 = sshll.u32 (!%p158_p3), %s742_s15, 4 }
  0x1f   : > { %s164_s18 = scalar_lea.sflag (!%p158_p3), [#allocation3], %s742_s15  ;;  %s167_s20 = scalar_lea.vmem (!%p158_p3), [#allocation2], %s417_s16 }
  0x23   : > { %616 = dma.done.wait (%p715_p8), %s164_s18, 256  }
  0x24   : > { %618 = vsyncadd (%p715_p8), %s164_s18, 4294967040  ;;  %v199_v0 = vld [vmem:[%s167_s20] sm:$0xff]  ;;  %v200_v1 = vld [vmem:[%s167_s20 + $0x8] sm:$0xff]  ;;  %v194_v8 = vlaneseq  ;;  %s279_s25 = scalar_lea.hbm %s809_s1, %s641_s12  ;;  %s185_s26 = scalar_lea.vmem [#allocation5], %s742_s15 }
  0x25   : > { %v419_v2 = vmul.f32 -1.442695, %v199_v0  ;;  %v420_v3 = vmul.f32 -1.442695, %v200_v1  ;;  %s281_s27 = sshll.u32 %s185_s26, 4  ;;  %s283_s28 = sshll.u32 %s279_s25, 4  ;;  %s282_s27 = int_to_ptr.vmem [resolvable:$true] %s281_s27  ;;  %s284_s28 = int_to_ptr.hbm [resolvable:$true] %s283_s28 }
  0x26   : > { %v195_v12 = vand.u32 127, %v194_v8  ;;  %s265_s29 = scalar_lea.sflag [#allocation4], %s742_s15  ;;  %s549_s30 = sshra.s32 %s284_s28, 4  ;;  %s550_s30 = int_to_ptr.hbm [resolvable:$true] %s549_s30 }
  0x27   : > { %497 = vpow2.f32 %v419_v2  ;;  %s551_s3 = scalar_lea.hbm %s550_s30, 1  ;;  %s555_s6 = scalar_lea.hbm %s809_s1, 2 }
  0x28   : > { %499 = vpow2.f32 %v420_v3  ;;  %vm198_vm7 = vcmp.lt.s32.totalorder %v195_v12, 92  ;;  %p552_p4 = scmp.ne.s32.totalorder %s550_s30, %s551_s3  ;;  %p556_p7 = scmp.lt.s32.totalorder %s550_s30, %s809_s1 }
  0x29   : > { %p557_p8 = scmp.lt.s32.totalorder %s555_s6, %s551_s3 }
  0x2a   : > { %p553_p5 = pnand %p552_p4, %p719_p9 }
  0x2b   : > { %p558_p10 = por %p557_p8, %p556_p7 }
  0x2c   : > { %p554_p6 = pneg %p553_p5 }
  0x2d   : > { %v498_v4 = vpop.eup %497 }
  0x2e   : > { %v500_v5 = vpop.eup %499  ;;  %v207_v6 = vadd.f32 1.0, %v498_v4  ;;  %p559_p13 = pnand %p558_p10, %p554_p6 }
  0x2f   : > { %v208_v7 = vadd.f32 1.0, %v500_v5 }
  0x30   : > { %501 = vrcp.f32 %v207_v6  ;;  %vm214_vm0 = vweird.f32 %v207_v6  ;;  %v220_v13 = vand.u32 2147483648, %v207_v6  ;;  %v218_v16 = vand.u32 2147483647, %v207_v6 }
  0x31   : > { %503 = vrcp.f32 %v208_v7  ;;  %v235_v17 = vand.u32 2147483648, %v208_v7  ;;  %vm229_vm2 = vweird.f32 %v208_v7  ;;  %v233_v19 = vand.u32 2147483647, %v208_v7 }
  0x32   : > { %v221_v21 = vor.u32 1.1754944e-38, %v220_v13  ;;  %vm219_vm5 = vcmp.eq.f32.partialorder %v218_v16, 8.507059e+37 }
  0x33   : > { %v236_v24 = vor.u32 1.1754944e-38, %v235_v17  ;;  %vm234_vm8 = vcmp.eq.f32.partialorder %v233_v19, 8.507059e+37 }
  0x36   : > { %v502_v9 = vpop.eup %501 }
  0x37   : > { %v504_v10 = vpop.eup %503  ;;  %v210_v11 = vmul.f32 %v502_v9, %v207_v6  ;;  %vm215_vm1 = vweird.f32 %v502_v9 }
  0x38   : > { %v225_v14 = vmul.f32 %v504_v10, %v208_v7  ;;  %vm230_vm3 = vweird.f32 %v504_v10  ;;  %vm216_vm4 = vmor %vm214_vm0, %vm215_vm1 }
  0x39   : > { %v211_v15 = vsub.f32 1.0, %v210_v11  ;;  %vm231_vm6 = vmor %vm229_vm2, %vm230_vm3 }
  0x3a   : > { %v226_v18 = vsub.f32 1.0, %v225_v14 }
  0x3b   : > { %v212_v20 = vmul.f32 %v502_v9, %v211_v15 }
  0x3c   : > { %v227_v22 = vmul.f32 %v504_v10, %v226_v18 }
  0x3d   : > { %v213_v23 = vadd.f32 %v502_v9, %v212_v20 }
  0x3e   : > { %v228_v25 = vadd.f32 %v504_v10, %v227_v22 }
  0x3f   : > { %v217_v26 = vsel %vm216_vm4, %v502_v9, %v213_v23 }
  0x40   : > { %v222_v27 = vsel %vm219_vm5, %v221_v21, %v217_v26  ;;  %v232_v28 = vsel %vm231_vm6, %v504_v10, %v228_v25 }
  0x41   : > { %v237_v29 = vsel %vm234_vm8, %v236_v24, %v232_v28  ;;  %v250_v30 = vsel %vm198_vm7, %v222_v27, 0.0 }
  0x42   : > { %v251_v31 = vsel %vm198_vm7, %v237_v29, 0.0  ;;  %v239_v33 = vmax.f32 %v222_v27, %v237_v29 }
  0x43   : > { %v252_v32 = vadd.f32 %v251_v31, %v250_v30 }
  0x44   : > { %v240_v34 = vrot.slane %v239_v33, 4 }
  0x45   : > { %253 = vadd.xlane.f32.xlu0 %v252_v32 }
  0x46   : > { %v241_v35 = vmax.f32 %v239_v33, %v240_v34 }
  0x48   : > { %v242_v36 = vrot.slane %v241_v35, 2 }
  0x4a   : > { %v243_v37 = vmax.f32 %v241_v35, %v242_v36 }
  0x4c   : > { %v244_v38 = vrot.slane %v243_v37, 1 }
  0x4e   : > { %v245_v39 = vmax.f32 %v243_v37, %v244_v38 }
  0x50   : > { %v246_v40 = vsel %vm198_vm7, %v245_v39, -1.0 }
  0x51   : > { %247 = vst [vmem:[%s185_s26] sm:$0x1] %v246_v40 }
  0x52   : > { %562 = shalt.err (!%p559_p13)
}
  0x53   : > { %430 = dma.vmem_to_hbm [thread:$0]  (%p719_p9), %s282_s27, 16, %s284_s28, %s265_s29  }
  0x54   : > { %s418_s16 = sshll.u32 %s742_s15, 3  ;;  %s422_s18 = sshll.u32 %s641_s12, 3 }
  0x55   : > { %s294_s21 = scalar_lea.hbm %s810_s2, %s422_s18  ;;  %s192_s25 = scalar_lea.vmem [#allocation6], %s418_s16 }
  0x56   : > { %s296_s26 = sshll.u32 %s192_s25, 4  ;;  %s298_s30 = sshll.u32 %s294_s21, 4  ;;  %s297_s26 = int_to_ptr.vmem [resolvable:$true] %s296_s26  ;;  %s299_s30 = int_to_ptr.hbm [resolvable:$true] %s298_s30 }
  0x57   : > { %s269_s28 = scalar_lea.sflag [#allocation7], %s742_s15  ;;  %s577_s29 = sshra.s32 %s299_s30, 4  ;;  %s578_s29 = int_to_ptr.hbm [resolvable:$true] %s577_s29 }
  0x58   : > { %s579_s3 = scalar_lea.hbm %s578_s29, 8  ;;  %s583_s5 = scalar_lea.hbm %s810_s2, 16 }
  0x59   : > { %p580_p0 = scmp.ne.s32.totalorder %s578_s29, %s579_s3  ;;  %p584_p3 = scmp.lt.s32.totalorder %s578_s29, %s810_s2 }
  0x5a   : > { %p585_p4 = scmp.lt.s32.totalorder %s583_s5, %s579_s3 }
  0x5b   : > { %p581_p1 = pnand %p580_p0, %p719_p9 }
  0x5c   : > { %p586_p5 = por %p585_p4, %p584_p3 }
  0x5d   : > { %p582_p2 = pneg %p581_p1 }
  0x5f   : > { %p587_p6 = pnand %p586_p5, %p582_p2 }
  0xb8   : > { %v254_v41 = vpop.xlane.xlu0 %253 }
  0xb9   : > { %v255_v42 = vrot.slane %v254_v41, 4 }
  0xbb   : > { %v256_v43 = vadd.f32 %v255_v42, %v254_v41 }
  0xbd   : > { %v257_v44 = vrot.slane %v256_v43, 2 }
  0xbf   : > { %v258_v45 = vadd.f32 %v257_v44, %v256_v43 }
  0xc1   : > { %v259_v46 = vrot.slane %v258_v45, 1 }
  0xc3   : > { %v260_v47 = vadd.f32 %v259_v46, %v258_v45 }
  0xc5   : > { %426 = vpush %v260_v47 }
  0xf6   : > { %s427_s27 = spop %426 }
  0xf7   : > { %v262_v48 = vstv %s427_s27 }
  0xf8   : > { %263 = vst [vmem:[%s192_s25] sm:$0xff] %v262_v48 }
  0xf9   : > { %590 = shalt.err (!%p587_p6)
}
  0xfa   : > { %431 = dma.vmem_to_hbm [thread:$0]  (%p719_p9), %s297_s26, 128, %s299_s30, %s269_s28  }
  0xfb PF: > { %s310_s15 = sand.u32 1, %s629_s9   ;;  %p439_p7 = pnand %p412_p12, %p726_p11 }
  0xfc   : > { %s311_s8 = scalar_lea.sflag [#allocation4], %s310_s15 }
  0xfd   : > { %p440_p8 = pneg %p439_p7 }
  0xff   : > { %620 = dma.done.wait (%p440_p8), %s311_s8, 16  }
 0x100   : > { %622 = vsyncadd (%p440_p8), %s311_s8, 4294967280  ;;  %s320_s16 = scalar_lea.sflag [#allocation7], %s310_s15 }
 0x101   : > { %624 = dma.done.wait (%p440_p8), %s320_s16, 128  }
 0x102   : > { %626 = vsyncadd (%p440_p8), %s320_s16, 4294967168  ;;  %s22_s14 = sadd.s32 1, %s649_s14   ;;  %s815_s9 = smov %s633_s10 }
 0x103   : > { %p19_p10 = scmp.ge.s32.totalorder %s22_s14, 4   ;;  %s816_s10 = smov %s637_s11 }
 0x104   : > { %s817_s11 = smov %s724_s23  ;;  %s818_s12 = smov %s645_s13 }
 0x105   : > { %s819_s13 = smov %s821_s17  ;;  %21 = sbr.rel (!%p19_p10) target bundleno = 8 (0x8), region = 86 }
 0x10a   :  { %326 = vsyncpa [#allocation3], 1 }
 0x10b   :  { %328 = vsyncpa [#allocation3 + $0x1], 1 }
 0x10c   :  { %329 = vsyncpa [#allocation4], 1 }
 0x10d   :  { %331 = vsyncpa [#allocation4 + $0x1], 1 }
 0x10e   :  { %332 = vsyncpa [#allocation7], 1 }
 0x10f   :  { %334 = vsyncpa [#allocation7 + $0x1], 1 }

</bundles_post_ra>
